<compile_context>
chip_gen: v7x
topology: tpu7x:2x2x1
jax: 0.10.0
libtpu: 0.0.40
codegen_flags: <defaults>
</compile_context>

<pallas_src>
import functools

import jax
import jax.numpy as jnp
from jax import lax
from jax.experimental import pallas as pl
from jax.experimental.pallas import tpu as pltpu


# ------------------------------ Pallas kernel -------------------------------


def _pool_fused_kernel(*refs, H, W, ksize, stride, mode, has_sel):
    """One (batch, Cout-tile) block of fused conv1x1 + BN(eval) + pool.

    Layouts (spatial flattened on the lane axis, all lane-dense):
      x_ref  : (1, Cin, H*W)    NCHW input, HW flattened
      w_ref  : (TC, Cin)        folded conv+BN weight tile
      b_ref  : (TC, 1)          folded bias tile
      cr_ref : (2, H*W) int32   [col; row] index maps        (max mode only)
      s_ref  : (H*W, Ho*Wo)     pooling / one-hot subsample matrix
      o_ref  : (1, TC, Ho*Wo)   NCHW output, HoWo flattened
    """
    if mode == "avg":
        x_ref, w_ref, b_ref, s_ref, o_ref = refs
    elif has_sel:
        x_ref, w_ref, b_ref, cr_ref, s_ref, o_ref = refs
    else:
        x_ref, w_ref, b_ref, cr_ref, o_ref = refs
        s_ref = None

    # conv1x1 + folded BatchNorm on the MXU: (TC,Cin) @ (Cin,HW) -> (TC,HW)
    y = jnp.dot(w_ref[...], x_ref[0], preferred_element_type=jnp.float32)

    if mode == "avg":
        # S columns each sum to 1 (count_include_pad=False), so the per-channel
        # bias commutes with the pooling matmul: pool(y + b) == pool(y) + b.
        pooled = jnp.dot(y, s_ref[...], preferred_element_type=jnp.float32)
        o_ref[...] = (pooled + b_ref[...])[None].astype(o_ref.dtype)
        return

    # ------------------------------ max path -------------------------------
    y = y + b_ref[...]
    pad = ksize // 2
    neg_inf = jnp.float32(-jnp.inf)
    col = cr_ref[0:1, :]                       # (1, HW)  w-index of each lane
    row = cr_ref[1:2, :]                       # (1, HW)  h-index of each lane

    # Separable stride-1 "same" max pooling; halo handled with masks in vregs
    # (no padded VMEM scratch round trip).  W pass:
    red = None
    for dx in range(ksize):
        s = dx - pad
        z = jnp.roll(y, -s, axis=-1) if s != 0 else y        # z[f] = y[f+s]
        z = jnp.where((col + s >= 0) & (col + s < W), z, neg_inf)
        red = z if red is None else jnp.maximum(red, z)

    # H pass (shift by multiples of W in the flattened axis):
    acc = None
    for dy in range(ksize):
        s = dy - pad
        z = jnp.roll(red, -s * W, axis=-1) if s != 0 else red
        z = jnp.where((row + s >= 0) & (row + s < H), z, neg_inf)
        acc = z if acc is None else jnp.maximum(acc, z)

    if s_ref is not None:
        # strided (stride>1) output subsample as a one-hot gather on the MXU
        acc = jnp.dot(acc, s_ref[...], preferred_element_type=jnp.float32)
    o_ref[...] = acc[None].astype(o_ref.dtype)


# ------------------------------ JAX wrapper ---------------------------------


def pool_forward(x_nchw, conv_w, gamma, beta, running_mean, running_var, *,
                 stride, ksize, mode, eps=1e-5):
    """Pool.forward: conv1x1(bias=False) -> BatchNorm2d(eval) -> Avg/MaxPool2d."""
    if mode not in ("avg", "max"):
        raise ValueError("Unknown pooling method {}".format(mode))
    if mode == "max" and ksize % 2 != 1:
        # TODO(synk): even-ksize max pooling (window not centered) not implemented.
        raise NotImplementedError("max path assumes odd ksize")

    N, Cin, H, W = x_nchw.shape
    Cout = conv_w.shape[0]
    pad = ksize // 2
    Ho = (H + 2 * pad - ksize) // stride + 1
    Wo = (W + 2 * pad - ksize) // stride + 1
    HW, HoWo = H * W, Ho * Wo

    # Fold conv1x1 (bias=False) + BatchNorm2d (running stats) into one W, b.
    scale = gamma * lax.rsqrt(running_var + eps)                    # (Cout,)
    w_fold = (conv_w[:, :, 0, 0] * scale[:, None]).astype(jnp.float32)   # (Cout,Cin)
    b_fold = (beta - running_mean * scale).reshape(Cout, 1).astype(jnp.float32)

    # Contiguous-dim reshape only: stays NCHW in HBM, no transpose / copy.
    x_flat = x_nchw.reshape(N, Cin, HW)

    # Pooling geometry (pure compile-time shapes).
    h_idx, ho_idx = jnp.arange(H)[:, None], jnp.arange(Ho)[None, :]
    w_idx, wo_idx = jnp.arange(W)[:, None], jnp.arange(Wo)[None, :]
    in_h = ((h_idx - (ho_idx * stride - pad)) >= 0) & \
           ((h_idx - (ho_idx * stride - pad)) < ksize)              # (H, Ho)
    in_w = ((w_idx - (wo_idx * stride - pad)) >= 0) & \
           ((w_idx - (wo_idx * stride - pad)) < ksize)              # (W, Wo)

    has_sel = (mode == "avg") or stride > 1
    if mode == "avg":
        # count_include_pad=False averaging matrix: S[f,g] = 1/count[g] if f in win g.
        member = in_h[:, None, :, None] & in_w[None, :, None, :]    # (H,W,Ho,Wo)
        count = in_h.sum(0)[:, None] * in_w.sum(0)[None, :]         # (Ho, Wo)
        S = (member.astype(jnp.float32) /
             count.astype(jnp.float32)).reshape(HW, HoWo)
    elif has_sel:
        # one-hot window-center selector for the strided max subsample
        sel_h = h_idx == ho_idx * stride
        sel_w = w_idx == wo_idx * stride
        S = (sel_h[:, None, :, None] & sel_w[None, :, None, :]
             ).astype(jnp.float32).reshape(HW, HoWo)
    else:
        S = None

    # Cout tile: only tile when large and 128-aligned (keeps weight tiles aligned).
    tc = 128 if (Cout > 128 and Cout % 128 == 0) else Cout
    nct = Cout // tc

    in_specs = [
        pl.BlockSpec((1, Cin, HW), lambda n, c: (n, 0, 0)),
        pl.BlockSpec((tc, Cin), lambda n, c: (c, 0)),
        pl.BlockSpec((tc, 1), lambda n, c: (c, 0)),
    ]
    args = [x_flat, w_fold, b_fold]

    if mode == "max":
        cc = jnp.arange(HW, dtype=jnp.int32)
        colrow = jnp.stack([cc % W, cc // W])                       # (2, HW)
        in_specs.append(pl.BlockSpec((2, HW), lambda n, c: (0, 0)))
        args.append(colrow)
    if S is not None:
        in_specs.append(pl.BlockSpec((HW, HoWo), lambda n, c: (0, 0)))
        args.append(S)

    flops = 2 * N * Cout * Cin * HW
    if S is not None:
        flops += 2 * N * Cout * HW * HoWo
    bytes_accessed = 4 * (x_flat.size + w_fold.size + b_fold.size
                          + (S.size if S is not None else 0)
                          + N * Cout * HoWo)

    kernel = functools.partial(
        _pool_fused_kernel, H=H, W=W, ksize=ksize, stride=stride, mode=mode,
        has_sel=has_sel)

    out_flat = pl.pallas_call(
        kernel,
        out_shape=jax.ShapeDtypeStruct((N, Cout, HoWo), jnp.float32),
        grid=(N, nct),
        in_specs=in_specs,
        out_specs=pl.BlockSpec((1, tc, HoWo), lambda n, c: (n, c, 0)),
        compiler_params=pltpu.CompilerParams(
            dimension_semantics=("parallel", "parallel")),
        cost_estimate=pl.CostEstimate(
            flops=flops, transcendentals=0, bytes_accessed=bytes_accessed),
    )(*args)

    return out_flat.reshape(N, Cout, Ho, Wo)    # contiguous reshape, no copy


# -------------------------------- Reference ---------------------------------


def _reference(
    x_nchw, conv_w, gamma, beta, rmean, rvar, *, stride, ksize, mode, eps=1e-5
):
    x = jnp.transpose(x_nchw, (0, 2, 3, 1))
    scale = gamma * lax.rsqrt(rvar + eps)
    w_fold = (conv_w[:, :, 0, 0] * scale[:, None]).T
    b_fold = beta - rmean * scale
    y = jnp.einsum("nhwc,cd->nhwd", x, w_fold) + b_fold
    pad = ksize // 2
    pads = [(0, 0), (pad, pad), (pad, pad), (0, 0)]
    win, strd = (1, ksize, ksize, 1), (1, stride, stride, 1)
    if mode == "avg":
        s = lax.reduce_window(y, 0.0, lax.add, win, strd, pads)
        c = lax.reduce_window(jnp.ones_like(y), 0.0, lax.add, win, strd, pads)
        out = s / c                      # count_include_pad=False (as in Pool)
    else:
        out = lax.reduce_window(y, -jnp.inf, lax.max, win, strd, pads)
    return jnp.transpose(out, (0, 3, 1, 2))


# ---------------------------------- Main -------------------------------------

if __name__ == "__main__":
    N, C_in, H, W = 2, 4, 16, 16
    C_out, stride, ksize = 8, 2, 3

    key = jax.random.PRNGKey(0)
    k1, k2, k3, k4, k5, k6 = jax.random.split(key, 6)
    x = jax.random.normal(k1, (N, C_in, H, W), jnp.float32)
    conv_w = jax.random.normal(k2, (C_out, C_in, 1, 1), jnp.float32) * 0.1
    gamma = jax.random.uniform(k3, (C_out,), jnp.float32, 0.5, 1.5)
    beta = jax.random.normal(k4, (C_out,), jnp.float32) * 0.1
    running_mean = jax.random.normal(k5, (C_out,), jnp.float32) * 0.1
    running_var = jax.random.uniform(k6, (C_out,), jnp.float32, 0.5, 1.5)

    for mode in ("avg", "max"):
        out = pool_forward(
            x, conv_w, gamma, beta, running_mean, running_var,
            stride=stride, ksize=ksize, mode=mode,
        )
        out = jax.block_until_ready(out)
        ref = _reference(
            x, conv_w, gamma, beta, running_mean, running_var,
            stride=stride, ksize=ksize, mode=mode,
        )
        assert out.shape == ref.shape, (out.shape, ref.shape)
        assert jnp.allclose(out, ref, atol=5e-3, rtol=5e-3), (
            f"mismatch in mode={mode}: max abs err "
            f"{float(jnp.max(jnp.abs(out - ref)))}"
        )

    print("KERNEL_OK")
</pallas_src>

<mosaic_0001>
module attributes {stable_mosaic.version = 11 : i64} {
  func.func @_pool_fused_kernel(%arg0: i32, %arg1: i32, %arg2: memref<1x4x256xf32, #tpu.memory_space<vmem>>, %arg3: memref<8x4xf32, #tpu.memory_space<vmem>>, %arg4: memref<8x1xf32, #tpu.memory_space<vmem>>, %arg5: memref<256x64xf32, #tpu.memory_space<vmem>>, %arg6: memref<1x8x64xf32, #tpu.memory_space<vmem>>) attributes {dimension_semantics = [#tpu.dimension_semantics<parallel>, #tpu.dimension_semantics<parallel>], iteration_bounds = array<i64: 2, 1>, scalar_prefetch = 0 : i64, scratch_operands = 0 : i64, tpu.core_type = #tpu.core_type<tc>, window_params = [{transform_indices = @transform_0, window_bounds = array<i64: 1, 4, 256>}, {transform_indices = @transform_1, window_bounds = array<i64: 8, 4>}, {transform_indices = @transform_2, window_bounds = array<i64: 8, 1>}, {pipeline_mode = #tpu.pipeline_mode<synchronous>, transform_indices = @transform_3, window_bounds = array<i64: 256, 64>}, {transform_indices = @transform_4, window_bounds = array<i64: 1, 8, 64>}]} {
    %c0 = arith.constant 0 : index
    %c0_0 = arith.constant 0 : index
    %0 = vector.load %arg3[%c0, %c0_0] : memref<8x4xf32, #tpu.memory_space<vmem>>, vector<8x4xf32>
    %c0_1 = arith.constant 0 : index
    %c0_2 = arith.constant 0 : index
    %c0_3 = arith.constant 0 : index
    %1 = vector.load %arg2[%c0_1, %c0_2, %c0_3] : memref<1x4x256xf32, #tpu.memory_space<vmem>>, vector<1x4x256xf32>
    %2 = vector.shape_cast %1 : vector<1x4x256xf32> to vector<4x256xf32>
    %cst = arith.constant dense<0.000000e+00> : vector<8x256xf32>
    %3 = tpu.matmul %0, %2, %cst {dimension_numbers = #tpu.dot_dimension_numbers<[1], [0], [0], [1], [0, 0, 1, 1], [], []>} : vector<8x4xf32>, vector<4x256xf32>, vector<8x256xf32> -> vector<8x256xf32>
    %c0_4 = arith.constant 0 : index
    %c0_5 = arith.constant 0 : index
    %4 = vector.load %arg5[%c0_4, %c0_5] : memref<256x64xf32, #tpu.memory_space<vmem>>, vector<256x64xf32>
    %cst_6 = arith.constant dense<0.000000e+00> : vector<8x64xf32>
    %5 = tpu.matmul %3, %4, %cst_6 {dimension_numbers = #tpu.dot_dimension_numbers<[1], [0], [0], [1], [0, 0, 1, 1], [], []>} : vector<8x256xf32>, vector<256x64xf32>, vector<8x64xf32> -> vector<8x64xf32>
    %c0_7 = arith.constant 0 : index
    %c0_8 = arith.constant 0 : index
    %6 = vector.load %arg4[%c0_7, %c0_8] : memref<8x1xf32, #tpu.memory_space<vmem>>, vector<8x1xf32>
    %7 = vector.broadcast %6 : vector<8x1xf32> to vector<8x64xf32>
    %8 = arith.addf %5, %7 : vector<8x64xf32>
    %9 = vector.shape_cast %8 : vector<8x64xf32> to vector<1x8x64xf32>
    %c0_9 = arith.constant 0 : index
    %c0_10 = arith.constant 0 : index
    %c0_11 = arith.constant 0 : index
    %10 = vector.load %arg6[%c0_9, %c0_10, %c0_11] : memref<1x8x64xf32, #tpu.memory_space<vmem>>, vector<1x8x64xf32>
    tpu.vector_store %arg6[%c0_9, %c0_10, %c0_11], %9 {strides = array<i32>} : memref<1x8x64xf32, #tpu.memory_space<vmem>>, vector<1x8x64xf32>,
    return
  }
  func.func @transform_0(%arg0: i32, %arg1: i32) -> (i32, i32, i32) {
    %c0_i32 = arith.constant 0 : i32
    %c0_i32_0 = arith.constant 0 : i32
    %c0_i32_1 = arith.constant 0 : i32
    return %arg0, %c0_i32, %c0_i32_0 : i32, i32, i32
  }
  func.func @transform_1(%arg0: i32, %arg1: i32) -> (i32, i32) {
    %c0_i32 = arith.constant 0 : i32
    %c0_i32_0 = arith.constant 0 : i32
    return %arg1, %c0_i32 : i32, i32
  }
  func.func @transform_2(%arg0: i32, %arg1: i32) -> (i32, i32) {
    %c0_i32 = arith.constant 0 : i32
    %c0_i32_0 = arith.constant 0 : i32
    return %arg1, %c0_i32 : i32, i32
  }
  func.func @transform_3(%arg0: i32, %arg1: i32) -> (i32, i32) {
    %c0_i32 = arith.constant 0 : i32
    %c0_i32_0 = arith.constant 0 : i32
    %c0_i32_1 = arith.constant 0 : i32
    return %c0_i32, %c0_i32_0 : i32, i32
  }
  func.func @transform_4(%arg0: i32, %arg1: i32) -> (i32, i32, i32) {
    %c0_i32 = arith.constant 0 : i32
    %c0_i32_0 = arith.constant 0 : i32
    return %arg0, %arg1, %c0_i32 : i32, i32, i32
  }
}

</mosaic_0001>

<bundles_post_ra>
// kernel: tpu_custom_call.1
= control target key start
LH: loop header
LB: loop body
LE: loop exit
PB: predicated region body
PF: predicated region fallthrough
CT: control target
= control target key end

     0   :  { %9 = vsyncpa [#allocation3], 0  ;;  %s1017_s0 = inlined_call_operand.vmem [shape: f32[2,4,256], index: 0, kind: input, shape index: {}]   ;;  %s1018_s1 = inlined_call_operand.vmem [shape: f32[8,4], index: 1, kind: input, shape index: {}]   ;;  %s1019_s2 = inlined_call_operand.vmem [shape: f32[8,1], index: 2, kind: input, shape index: {}]   ;;  %s1020_s3 = inlined_call_operand.vmem [shape: f32[256,64], index: 3, kind: input, shape index: {}]   ;;  %s1021_s4 = inlined_call_operand.hbm [shape: f32[2,8,64], index: 4, kind: output, shape index: {}]  }
   0x1   :  { %11 = vsyncpa [#allocation3 + $0x1], 0  ;;  %s803_s15 = smov 0   ;;  %s805_s16 = smov 0  }
   0x2   :  { %s807_s17 = smov 0   ;;  %s809_s18 = smov 0  }
   0x3   :  { %s811_s19 = smov 0   ;;  %s813_s20 = smov 0  }
   0x4 LB: > { %s551_s21 = sadd.s32 4294967295, %s773_s20   ;;  %s552_s22 = sadd.s32 4294967294, %s773_s20   ;;  %s773_s20 = sphi %s813_s20, %s17_s20   ;;  %s769_s19 = sphi %s811_s19, %s1028_s19   ;;  %s765_s18 = sphi %s809_s18, %s1027_s18   ;;  %s761_s17 = sphi %s807_s17, %s1026_s17   ;;  %s757_s16 = sphi %s805_s16, %s1025_s16   ;;  %s753_s15 = sphi %s803_s15, %s1024_s15  }
   0x5   : > { %s29_s23 = sadd.s32 1, %s769_s19  ;;  %s137_s24 = sadd.s32 1, %s761_s17 }
   0x6   : > { %p31_p0 = scmp.ge.s32.totalorder %s29_s23, 2  ;;  %p147_p1 = scmp.ne.s32.totalorder %s761_s17, %s757_s16 }
   0x7   : > { %p148_p2 = scmp.eq.s32.totalorder %s551_s21, 1  ;;  %p153_p3 = scmp.ne.s32.totalorder %s757_s16, %s753_s15 }
   0x8   : > { %s1030_s23 = smov (%p31_p0, %s29_s23), 0  ;;  %p154_p5 = scmp.eq.s32.totalorder %s552_s22, 1 }
   0x9   : > { %p843_p4 = por %p148_p2, %p147_p1  ;;  %s132_s26 = ssub.s32 %s769_s19, %s1030_s23 }
   0xa   : > { %p557_p6 = scmp.ge.s32.totalorder %s773_s20, 1  ;;  %p135_p7 = scmp.eq.s32.totalorder %s132_s26, 0 }
   0xb   : > { %p850_p8 = por %p154_p5, %p153_p3  ;;  %p197_p9 = scmp.lt.s32.totalorder %s773_s20, 3 }
   0xc   : > { %s856_s28 = scalar_select %p135_p7, %s761_s17, %s137_s24  }
   0xd   : > { %p198_p10 = pnand %p557_p6, %p197_p9 }
   0xe   : > { %p231_p11 = scmp.lt.s32.totalorder (!%p198_p10), %s765_s18, 1  ;;  %v344_v0 = vld [vmem:[%s1020_s3 + $0x80] sm:$0xff] (!%p198_p10)  ;;  %v775_v1 = vmov (!%p198_p10), 0.0   ;;  %v345_v2 = vld [vmem:[%s1020_s3 + $0x88] sm:$0xff] (!%p198_p10)  ;;  %v346_v7 = vld [vmem:[%s1020_s3 + $0x90] sm:$0xff] (!%p198_p10)  ;;  %vm252_vm0 = vcmask (!%p198_p10), 1043456  }
   0xf   : > { %201 = sbr.rel (%p198_p10) target bundleno = 476 (0x1dc), region = 36  ;;  %321 = vmatprep.mubr.f32.mxu0 (!%p198_p10), %v775_v1  ;;  %v328_v3 = vld [vmem:[%s1020_s3] sm:$0xff] (!%p198_p10)  ;;  %v329_v4 = vld [vmem:[%s1020_s3 + $0x8] sm:$0xff] (!%p198_p10)  ;;  %v604_v5 = vpack.c.bf16 (!%p198_p10), %v345_v2, %v344_v0  ;;  %v347_v8 = vld [vmem:[%s1020_s3 + $0x98] sm:$0xff] (!%p198_p10)  ;;  %vm248_vm1 = vcmask (!%p198_p10), 31744   ;;  %v776_v53 = vmov (!%p198_p10), 0  }
  0x10   : > { %v606_v6 = vpack.c.bf16 (!%p198_p10), %v329_v4, %v328_v3  ;;  %v330_v9 = vld [vmem:[%s1020_s3 + $0x10] sm:$0xff] (!%p198_p10)  ;;  %v608_v10 = vpack.c.bf16 (!%p198_p10), %v347_v8, %v346_v7  ;;  %v331_v11 = vld [vmem:[%s1020_s3 + $0x18] sm:$0xff] (!%p198_p10)  ;;  %v348_v12 = vld [vmem:[%s1020_s3 + $0xa0] sm:$0xff] (!%p198_p10)  ;;  %693 = vset.pattern.permute.xlu0 (!%p198_p10), %v776_v53  ;;  %s228_s13 = sand.u32 (!%p198_p10), 1, %s757_s16   ;;  %s565_s21 = sshll.u32 (!%p198_p10), %s765_s18, 7  ;;  %vm436_vm2 = vcmask (!%p198_p10), 523264  }
  0x11   : > { %v349_v13 = vld [vmem:[%s1020_s3 + $0xa8] sm:$0xff] (!%p198_p10)  ;;  %605 = vmatprep.subr.bf16.mxu1 (!%p198_p10), %v604_v5  ;;  %v610_v14 = vpack.c.bf16 (!%p198_p10), %v331_v11, %v330_v9  ;;  %v332_v17 = vld [vmem:[%s1020_s3 + $0x20] sm:$0xff] (!%p198_p10)  ;;  %v350_v20 = vld [vmem:[%s1020_s3 + $0xb0] sm:$0xff] (!%p198_p10)  ;;  %s558_s14 = sshll.u32 (!%p198_p10), %s228_s13, 3  ;;  %s970_s29 = scalar_lea.hbm (!%p198_p10), %s1021_s4, %s565_s21 }
  0x12   : > { %607 = vmatpush3.bf16.msra.mxu1 (!%p198_p10), %v606_v6  ;;  %v612_v16 = vpack.c.bf16 (!%p198_p10), %v349_v13, %v348_v12  ;;  %v333_v18 = vld [vmem:[%s1020_s3 + $0x28] sm:$0xff] (!%p198_p10)  ;;  %v351_v21 = vld [vmem:[%s1020_s3 + $0xb8] sm:$0xff] (!%p198_p10)  ;;  %v244_v22 = vld [vmem:[%s1018_s1] sm:$0xff] (!%p198_p10)  ;;  %s230_s22 = scalar_lea.vmem (!%p198_p10), [#allocation2], %s558_s14  ;;  %s439_s30 = scalar_lea.sflag (!%p198_p10), [#allocation3], %s228_s13 }
  0x13   : > { %609 = vmatprep.subr.bf16.mxu1 (!%p198_p10), %v608_v10  ;;  %v614_v23 = vpack.c.bf16 (!%p198_p10), %v333_v18, %v332_v17  ;;  %v616_v24 = vpack.c.bf16 (!%p198_p10), %v351_v21, %v350_v20  ;;  %v334_v25 = vld [vmem:[%s1020_s3 + $0x30] sm:$0xff] (!%p198_p10)  ;;  %v335_v26 = vld [vmem:[%s1020_s3 + $0x38] sm:$0xff] (!%p198_p10)  ;;  %v352_v27 = vld [vmem:[%s1020_s3 + $0xc0] sm:$0xff] (!%p198_p10) }
  0x14   : > { %v353_v28 = vld [vmem:[%s1020_s3 + $0xc8] sm:$0xff] (!%p198_p10)  ;;  %v618_v29 = vpack.c.bf16 (!%p198_p10), %v335_v26, %v334_v25  ;;  %v336_v31 = vld [vmem:[%s1020_s3 + $0x40] sm:$0xff] (!%p198_p10)  ;;  %v354_v33 = vld [vmem:[%s1020_s3 + $0xd0] sm:$0xff] (!%p198_p10) }
  0x15   : > { %v620_v30 = vpack.c.bf16 (!%p198_p10), %v353_v28, %v352_v27  ;;  %v337_v32 = vld [vmem:[%s1020_s3 + $0x48] sm:$0xff] (!%p198_p10)  ;;  %v355_v34 = vld [vmem:[%s1020_s3 + $0xd8] sm:$0xff] (!%p198_p10)  ;;  %v338_v37 = vld [vmem:[%s1020_s3 + $0x50] sm:$0xff] (!%p198_p10) }
  0x16   : > { %s232_s11 = scalar_select %p231_p11, %s765_s18, 1  ;;  %611 = vmatpush3.bf16.msra.mxu1 %v610_v14  ;;  %v622_v35 = vpack.c.bf16 %v337_v32, %v336_v31  ;;  %v624_v36 = vpack.c.bf16 %v355_v34, %v354_v33  ;;  %v339_v38 = vld [vmem:[%s1020_s3 + $0x58] sm:$0xff]  ;;  %v356_v39 = vld [vmem:[%s1020_s3 + $0xe0] sm:$0xff]  ;;  %v357_v40 = vld [vmem:[%s1020_s3 + $0xe8] sm:$0xff] }
  0x17   : > { %613 = vmatprep.subr.bf16.mxu1 %v612_v16  ;;  %v626_v41 = vpack.c.bf16 %v339_v38, %v338_v37  ;;  %v628_v42 = vpack.c.bf16 %v357_v40, %v356_v39  ;;  %v340_v43 = vld [vmem:[%s1020_s3 + $0x60] sm:$0xff]  ;;  %v341_v44 = vld [vmem:[%s1020_s3 + $0x68] sm:$0xff]  ;;  %v358_v45 = vld [vmem:[%s1020_s3 + $0xf0] sm:$0xff]  ;;  %s777_s18 = smov [#allocation2]  }
  0x18   : > { %s568_s8 = sshll.u32 %s232_s11, 3  ;;  %v359_v46 = vld [vmem:[%s1020_s3 + $0xf8] sm:$0xff]  ;;  %v630_v47 = vpack.c.bf16 %v341_v44, %v340_v43  ;;  %v342_v49 = vld [vmem:[%s1020_s3 + $0x70] sm:$0xff]  ;;  %v360_v52 = vld [vmem:[%s1019_s2] sm:$0xff]  ;;  %s453_s11 = sshll.u32 %s230_s22, 4  ;;  %s972_s11 = int_to_ptr.vmem [resolvable:$true] %s453_s11 }
  0x19   : > { %s235_s12 = scalar_lea.vmem %s1017_s0, %s568_s8  ;;  %v632_v48 = vpack.c.bf16 %v359_v46, %v358_v45  ;;  %v343_v50 = vld [vmem:[%s1020_s3 + $0x78] sm:$0xff]  ;;  %363 = vperm.xlu0 %693, %v360_v52   ;;  %s695_s5 = scalar_lea.vmem %s972_s11, 128 }
  0x1a   : > { %v245_v15 = vld [vmem:[%s235_s12] sm:$0xff]  ;;  %615 = vmatpush3.bf16.msra.mxu1 %v614_v23  ;;  %v634_v51 = vpack.c.bf16 %v343_v50, %v342_v49  ;;  %p696_p12 = scmp.ne.s32.totalorder %s972_s11, %s695_s5  ;;  %s699_s6 = sshll.u32 %s777_s18, 4  ;;  %s700_s6 = int_to_ptr.vmem [resolvable:$false] %s699_s6 }
  0x1b   : > { %v247_v19 = vcombine.high %v245_v15, %v245_v15  ;;  %617 = vmatprep.subr.bf16.mxu1 %v616_v24  ;;  %s701_s7 = scalar_lea.vmem %s700_s6, 256  ;;  %p702_p1 = scmp.lt.s32.totalorder %s972_s11, %s700_s6 }
  0x1c   : > { %p697_p13 = pnand %p696_p12, %p843_p4  ;;  %p703_p2 = scmp.lt.s32.totalorder %s701_s7, %s695_s5 }
  0x1d   : > { %561 = vmatprep.subr.msk.mxu0 %vm252_vm0, %v247_v19 }
  0x1e   : > { %562 = vmatpush1.msk.msra.mxu0 %vm252_vm0, %v245_v15  ;;  %619 = vmatpush3.bf16.msra.mxu1 %v618_v29  ;;  %p698_p0 = pneg %p697_p13  ;;  %p704_p3 = por %p703_p2, %p702_p1 }
  0x1f   : > { %563 = vmatmul.mubr.msk.f32.vlgmr.msra.gmra.mrb[0].mxu0 %vm248_vm1, %v244_v22  ;;  %621 = vmatprep.subr.bf16.mxu1 %v620_v30 }
  0x20   : > { %p705_p5 = pnand %p704_p3, %p698_p0 }
  0x22   : > { %623 = vmatpush3.bf16.msra.mxu1 %v622_v35 }
  0x23   : > { %625 = vmatprep.subr.bf16.mxu1 %v624_v36 }
  0x26   : > { %627 = vmatpush3.bf16.msra.mxu1 %v626_v41 }
  0x27   : > { %629 = vmatprep.subr.bf16.mxu1 %v628_v42 }
  0x2a   : > { %631 = vmatpush3.bf16.msra.mxu1 %v630_v47 }
  0x2b   : > { %633 = vmatprep.subr.bf16.mxu1 %v632_v48 }
  0x2e   : > { %635 = vmatpush3.bf16.msra.mxu1 %v634_v51 }
  0x98   : > { %v364_v58 = vpop.permute.xlu0 %363 }
  0xf2   : > { %v323_v54 = vpop.f32.mrb[0].mxu0 }
  0xf3   : > { %v325_v55 = vpop.f32.mrb[1].mxu0 }
  0xf4   : > { %430 = vmatprep.mubr.f32.mxu1 %v325_v55 }
  0xf5   : > { %431 = vmatmul.mubr.f32.vlgmr.msra.gmra.mrb[0].mxu1 %v323_v54 }
 0x1c8   : > { %v601_v56 = vpop.f32.mrb[0].mxu1 }
 0x1c9   : > { %v602_v57 = vpop.f32.mrb[1].mxu1 }
 0x1ca   : > { %v603_v59 = vadd.f32 %v602_v57, %v601_v56 }
 0x1cc   : > { %v433_v60 = vadd.f32 %v603_v59, %v364_v58 }
 0x1ce   : > { %437 = vst.msk [vmem:[%s230_s22] sm:$0xff] %vm436_vm2, %v433_v60 }
 0x1cf   : > { %708 = shalt.err (!%p705_p5)
}
 0x1d0   : > { %s709_s8 = scalar_lea.hbm %s970_s29, 128  ;;  %s713_s12 = scalar_lea.hbm %s1021_s4, 256 }
 0x1d1   : > { %p710_p6 = scmp.ne.s32.totalorder %s970_s29, %s709_s8  ;;  %p714_p10 = scmp.lt.u32.totalorder %s970_s29, %s1021_s4 }
 0x1d2   : > { %p715_p11 = scmp.lt.u32.totalorder %s713_s12, %s709_s8  ;;  %p717_p13 = scmp.lt.u32.totalorder %s709_s8, %s970_s29 }
 0x1d3   : > { %p711_p7 = pnand %p710_p6, %p843_p4 }
 0x1d4   : > { %p716_p12 = por %p715_p11, %p714_p10 }
 0x1d5   : > { %p712_p9 = pneg %p711_p7 }
 0x1d6   : > { %p718_p0 = por %p717_p13, %p716_p12 }
 0x1d8   : > { %p719_p1 = pnand %p718_p0, %p712_p9 }
 0x1da   : > { %722 = shalt.err (!%p719_p1)
}
 0x1db   : > { %636 = dma.vmem_to_hbm [thread:$0]  (%p843_p4), %s972_s11, 128, %s970_s29, %s439_s30  }
 0x1dc PF: > { %p642_p2 = scmp.ge.s32.totalorder %s773_s20, 2  ;;  %s465_s21 = sand.u32 1, %s753_s15  }
 0x1dd   : > { %s466_s22 = scalar_lea.sflag [#allocation3], %s465_s21 }
 0x1de   : > { %p639_p3 = pnand %p642_p2, %p850_p8 }
 0x1e0   : > { %748 = dma.done.wait (!%p639_p3), %s466_s22, 128  }
 0x1e1   : > { %750 = vsyncadd (!%p639_p3), %s466_s22, 4294967168  ;;  %s17_s20 = sadd.s32 1, %s773_s20   ;;  %s1024_s15 = smov %s757_s16 }
 0x1e2   : > { %p14_p5 = scmp.ge.s32.totalorder %s17_s20, 4   ;;  %s1025_s16 = smov %s761_s17 }
 0x1e3   : > { %s1026_s17 = smov %s856_s28  ;;  %s1027_s18 = smov %s769_s19 }
 0x1e4   : > { %s1028_s19 = smov %s1030_s23  ;;  %16 = sbr.rel (!%p14_p5) target bundleno = 4 (0x4), region = 77 }
 0x1eb   :  { %471 = vsyncpa [#allocation3], 1 }
 0x1ec   :  { %473 = vsyncpa [#allocation3 + $0x1], 1 }

</bundles_post_ra>
